<compile_context>
chip_gen: v7x
topology: tpu7x:2x2x1
jax: 0.10.0
libtpu: 0.0.40
codegen_flags: <defaults>
</compile_context>

<pallas_src>
import jax
import jax.numpy as jnp
import numpy as np
from jax.experimental import pallas as pl
from jax.experimental.pallas import tpu as pltpu


_LANE = 128
_SUBLANE = 8
# ~4 MiB per block per buffer: 3 streams x 2 buffers = 24 MiB buffered
# footprint — near the HBM roofline on all generations, safely under v7x's
# 64 MiB per-TC VMEM.
_BLOCK_BYTES = 4 << 20
_VMEM_LIMIT_BYTES = 40 * 1024 * 1024
# Below this many bytes per batch slab, B tiny grid steps (~0.35 us each)
# lose to one fused XLA elementwise op.
_MIN_PALLAS_BYTES = 256 * 1024


def _mixup_kernel(perm_ref, lam_ref, x_ref, xp_ref, o_ref):
    """out = xp + lam * (x - xp)  on one (tR, 128) lane-dense block.

    perm_ref / lam_ref: SMEM scalar-prefetch refs, shape (B,).
    x_ref:  block of x at batch index b (batch dim squeezed).
    xp_ref: block of x at batch index perm_idx[b] (gathered via index_map).
    """
    b = pl.program_id(0)
    lam = lam_ref[b]                                   # f32 scalar from SMEM
    x = x_ref[...].astype(jnp.float32)
    xp = xp_ref[...].astype(jnp.float32)
    # xp + lam*(x - xp)  ==  lam*x + (1-lam)*xp  with one fewer multiply.
    o_ref[...] = (xp + lam * (x - xp)).astype(o_ref.dtype)


def _row_tiling(R, L, itemsize):
    """Rows per block: ~_BLOCK_BYTES, multiple of 8, preferably dividing R."""
    tR_max = max(_SUBLANE, (_BLOCK_BYTES // (L * itemsize)) // _SUBLANE * _SUBLANE)
    if tR_max >= R:
        return R, 1                       # full extent is always a legal block dim
    n = pl.cdiv(R, tR_max)
    cand = (R // n) // _SUBLANE * _SUBLANE
    if cand >= _SUBLANE and R % cand == 0:
        return cand, R // cand            # even tiles: every vst unmasked, every DMA full
    return tR_max, pl.cdiv(R, tR_max)     # ragged last tile; Pallas masks the edge


@jax.jit
def _mixup_pallas_lane_dense(x3, lam, perm_idx):
    """x3: (B, R, 128) lane-dense view of x; lam: (B,) f32; perm_idx: (B,) i32."""
    B, R, L = x3.shape
    itemsize = jnp.dtype(x3.dtype).itemsize
    tR, n_row_tiles = _row_tiling(R, L, itemsize)

    n_elems = B * R * L
    cost = pl.CostEstimate(flops=3 * n_elems, transcendentals=0,
                           bytes_accessed=3 * n_elems * itemsize)

    return pl.pallas_call(
        _mixup_kernel,
        out_shape=jax.ShapeDtypeStruct((B, R, L), x3.dtype),
        grid_spec=pltpu.PrefetchScalarGridSpec(
            num_scalar_prefetch=2,             # perm_idx, lam -> SMEM
            grid=(B, n_row_tiles),
            in_specs=[
                # x[b]
                pl.BlockSpec((None, tR, L), lambda b, r, perm, lam: (b, r, 0)),
                # x[perm[b]]: batch gather expressed directly in the index_map.
                pl.BlockSpec((None, tR, L), lambda b, r, perm, lam: (perm[b], r, 0)),
            ],
            out_specs=pl.BlockSpec((None, tR, L), lambda b, r, perm, lam: (b, r, 0)),
        ),
        compiler_params=pltpu.CompilerParams(
            # Every (b, r) block is independent -> shard across both TCs on v7x;
            # free/no-op on v5e/v6e.
            # TODO(synk): profile on v7x to confirm the grid shards across both
            # TensorCores; if not, add an explicit leading core axis.
            dimension_semantics=("parallel", "parallel"),
            vmem_limit_bytes=_VMEM_LIMIT_BYTES,
        ),
        cost_estimate=cost,
    )(perm_idx, lam, x3, x3)               # x passed twice: one stream per spec


@jax.jit
def _mixup_xla(x, lam, perm_idx):
    """Fused XLA fallback for tiny / non-lane-aligned slabs."""
    lam_b = lam.reshape((-1,) + (1,) * (x.ndim - 1)).astype(jnp.float32)
    xp = jnp.take(x, perm_idx, axis=0)
    out = x.astype(jnp.float32) * lam_b + (1.0 - lam_b) * xp.astype(jnp.float32)
    return out.astype(x.dtype)


def mixup_forward_pallas(x, lam, perm_idx, x_len=None, *,
                         min_pallas_bytes=_MIN_PALLAS_BYTES):
    """Pallas equivalent of MixUp.forward (mixup_process=True)."""
    if x.ndim not in (2, 3):
        raise ValueError("MixUp expects x of dim 2 or 3")

    B = x.shape[0]
    per_batch = int(np.prod(x.shape[1:]))
    itemsize = jnp.dtype(x.dtype).itemsize
    lam = lam.astype(jnp.float32)
    perm_idx = perm_idx.astype(jnp.int32)

    if per_batch % _LANE != 0 or per_batch * itemsize < min_pallas_bytes:
        # Small / lane-misaligned slabs: one fused elementwise op beats B tiny
        # Pallas steps with masked stores.
        out = _mixup_xla(x, lam, perm_idx)
    else:
        # Lane-dense plumbing: lam[b] is a per-batch scalar, so reshaping the
        # per-batch slab to (R, 128) changes nothing numerically.
        x3 = x.reshape(B, per_batch // _LANE, _LANE)
        out = _mixup_pallas_lane_dense(x3, lam, perm_idx).reshape(x.shape)

    if x_len is not None:
        # torch.max(torch.stack([x_len, x_len[perm_idx]], 1), -1) == elementwise max
        x_len = jnp.maximum(x_len, jnp.take(x_len, perm_idx, axis=0))
    return out, x_len


class MixUpPallas:
    """Mirrors the PyTorch MixUp module (sampling is deterministic glue in JAX)."""

    def __init__(self, mixup_process=True, alpha=1.0, task="dualtask"):
        self.mixup_process = mixup_process
        self.alpha = float(alpha)
        self.task = task
        self.lam = None
        self.perm_idx = None

    def sample(self, key, batch_size, num_list=None):
        if not self.mixup_process:
            self.lam = None
            self.perm_idx = None
            return
        if self.task == "dualtask":
            k1, k2, k3, k4 = jax.random.split(key, 4)
            lam1 = jax.random.beta(k1, self.alpha, self.alpha, (num_list[0],))
            lam2 = jax.random.beta(k2, self.alpha, self.alpha, (num_list[1],))
            perm1 = jax.random.permutation(k3, num_list[0])
            perm2 = jax.random.permutation(k4, num_list[1]) + num_list[0]
            lam = jnp.concatenate([lam1, lam2], 0)
            perm = jnp.concatenate([perm1, perm2], 0)
        else:
            k1, k2 = jax.random.split(key, 2)
            lam = jax.random.beta(k1, self.alpha, self.alpha, (batch_size,))
            perm = jax.random.permutation(k2, batch_size)
        # lam[lam < 0.5] = 1 - lam[lam < 0.5]
        self.lam = jnp.where(lam < 0.5, 1.0 - lam, lam).astype(jnp.float32)
        self.perm_idx = perm.astype(jnp.int32)

    def __call__(self, x, x_len=None, *, min_pallas_bytes=_MIN_PALLAS_BYTES):
        if not self.mixup_process:
            return x, x_len
        return mixup_forward_pallas(x, self.lam, self.perm_idx, x_len,
                                    min_pallas_bytes=min_pallas_bytes)


def _reference(x, lam, perm_idx, x_len=None):
    """Pure-JAX reference matching the PyTorch forward."""
    lam_b = lam.reshape((-1,) + (1,) * (x.ndim - 1)).astype(jnp.float32)
    xp = jnp.take(x, perm_idx, axis=0)
    out = (x.astype(jnp.float32) * lam_b
           + (1.0 - lam_b) * xp.astype(jnp.float32)).astype(x.dtype)
    if x_len is not None:
        x_len = jnp.maximum(x_len, jnp.take(x_len, perm_idx, axis=0))
    return out, x_len


if __name__ == "__main__":
    key = jax.random.PRNGKey(0)
    k_x, k_len, k_sample, k_x2, k_xb = jax.random.split(key, 5)

    # ---- 3-D path through the Pallas kernel (lane-dense (B, T*D/128, 128)) ----
    B, T, D = 4, 16, 128          # per-batch slab = 2048 elems, multiple of 128
    x = jax.random.normal(k_x, (B, T, D), dtype=jnp.float32)
    x_len = jax.random.randint(k_len, (B,), 1, T + 1, dtype=jnp.int32)

    mixup = MixUpPallas(mixup_process=True, alpha=1.0, task="dualtask")
    mixup.sample(k_sample, batch_size=B, num_list=[2, 2])

    out, out_len = mixup(x, x_len, min_pallas_bytes=0)   # force the Pallas path
    out = jax.block_until_ready(out)
    out_len = jax.block_until_ready(out_len)

    ref_out, ref_len = _reference(x, mixup.lam, mixup.perm_idx, x_len)
    assert out.shape == x.shape and out.dtype == x.dtype
    assert np.allclose(np.asarray(out), np.asarray(ref_out), rtol=1e-5, atol=1e-5)
    assert np.array_equal(np.asarray(out_len), np.asarray(ref_len))

    # ---- bf16 through the Pallas kernel (cast path + lane-dense stores) ----
    xb = jax.random.normal(k_xb, (B, T, D), dtype=jnp.float32).astype(jnp.bfloat16)
    outb, _ = mixup(xb, None, min_pallas_bytes=0)
    outb = jax.block_until_ready(outb)
    refb, _ = _reference(xb, mixup.lam, mixup.perm_idx, None)
    assert outb.shape == xb.shape and outb.dtype == jnp.bfloat16
    assert np.allclose(np.asarray(outb).astype(np.float32),
                       np.asarray(refb).astype(np.float32), rtol=2e-2, atol=2e-2)

    # ---- 2-D / small-D path: dispatches to the fused XLA fma ----
    x2 = jax.random.normal(k_x2, (B, 32), dtype=jnp.float32)
    out2, _ = mixup(x2, None)
    out2 = jax.block_until_ready(out2)
    ref2, _ = _reference(x2, mixup.lam, mixup.perm_idx, None)
    assert np.allclose(np.asarray(out2), np.asarray(ref2), rtol=1e-5, atol=1e-5)

    print("KERNEL_OK")
</pallas_src>

<mosaic_0001>
module attributes {stable_mosaic.version = 11 : i64} {
  func.func @_mixup_kernel(%arg0: i32, %arg1: i32, %arg2: memref<4xi32, #tpu.memory_space<smem>>, %arg3: memref<4xf32, #tpu.memory_space<smem>>, %arg4: memref<1x16x128xf32, #tpu.memory_space<vmem>>, %arg5: memref<1x16x128xf32, #tpu.memory_space<vmem>>, %arg6: memref<1x16x128xf32, #tpu.memory_space<vmem>>) attributes {dimension_semantics = [#tpu.dimension_semantics<parallel>, #tpu.dimension_semantics<parallel>], iteration_bounds = array<i64: 4, 1>, scalar_prefetch = 2 : i64, scratch_operands = 0 : i64, tpu.core_type = #tpu.core_type<tc>, window_params = [{transform_indices = @transform_0, window_bounds = array<i64: 1, 16, 128>}, {transform_indices = @transform_1, window_bounds = array<i64: 1, 16, 128>}, {transform_indices = @transform_2, window_bounds = array<i64: 1, 16, 128>}]} {
    %0 = arith.index_cast %arg0 : i32 to index
    %1 = memref.load %arg3[%0] : memref<4xf32, #tpu.memory_space<smem>>
    %c0 = arith.constant 0 : index
    %c0_0 = arith.constant 0 : index
    %c0_1 = arith.constant 0 : index
    %2 = vector.load %arg4[%c0, %c0_0, %c0_1] : memref<1x16x128xf32, #tpu.memory_space<vmem>>, vector<1x16x128xf32>
    %3 = vector.shape_cast %2 : vector<1x16x128xf32> to vector<16x128xf32>
    %c0_2 = arith.constant 0 : index
    %c0_3 = arith.constant 0 : index
    %c0_4 = arith.constant 0 : index
    %4 = vector.load %arg5[%c0_2, %c0_3, %c0_4] : memref<1x16x128xf32, #tpu.memory_space<vmem>>, vector<1x16x128xf32>
    %5 = vector.shape_cast %4 : vector<1x16x128xf32> to vector<16x128xf32>
    %6 = arith.subf %3, %5 : vector<16x128xf32>
    %7 = vector.broadcast %1 : f32 to vector<16x128xf32>
    %8 = arith.mulf %7, %6 : vector<16x128xf32>
    %9 = arith.addf %5, %8 : vector<16x128xf32>
    %c0_5 = arith.constant 0 : index
    %c0_6 = arith.constant 0 : index
    %c0_7 = arith.constant 0 : index
    %10 = vector.load %arg6[%c0_5, %c0_6, %c0_7] : memref<1x16x128xf32, #tpu.memory_space<vmem>>, vector<1x16x128xf32>
    %11 = vector.shape_cast %10 : vector<1x16x128xf32> to vector<16x128xf32>
    %12 = vector.shape_cast %9 : vector<16x128xf32> to vector<1x16x128xf32>
    tpu.vector_store %arg6[%c0_5, %c0_6, %c0_7], %12 {strides = array<i32>} : memref<1x16x128xf32, #tpu.memory_space<vmem>>, vector<1x16x128xf32>,
    return
  }
  func.func @transform_0(%arg0: i32, %arg1: i32, %arg2: memref<4xi32, #tpu.memory_space<smem>>, %arg3: memref<4xf32, #tpu.memory_space<smem>>) -> (i32, i32, i32) {
    %c0_i32 = arith.constant 0 : i32
    %c0_i32_0 = arith.constant 0 : i32
    return %arg0, %arg1, %c0_i32 : i32, i32, i32
  }
  func.func @transform_1(%arg0: i32, %arg1: i32, %arg2: memref<4xi32, #tpu.memory_space<smem>>, %arg3: memref<4xf32, #tpu.memory_space<smem>>) -> (i32, i32, i32) {
    %0 = arith.index_cast %arg0 : i32 to index
    %1 = memref.load %arg2[%0] : memref<4xi32, #tpu.memory_space<smem>>
    %c0_i32 = arith.constant 0 : i32
    %c0_i32_0 = arith.constant 0 : i32
    return %1, %arg1, %c0_i32 : i32, i32, i32
  }
  func.func @transform_2(%arg0: i32, %arg1: i32, %arg2: memref<4xi32, #tpu.memory_space<smem>>, %arg3: memref<4xf32, #tpu.memory_space<smem>>) -> (i32, i32, i32) {
    %c0_i32 = arith.constant 0 : i32
    %c0_i32_0 = arith.constant 0 : i32
    return %arg0, %arg1, %c0_i32 : i32, i32, i32
  }
}

</mosaic_0001>

<bundles_post_ra>
// kernel: _mixup_pallas_lane_dense.1
= control target key start
LH: loop header
LB: loop body
LE: loop exit
PB: predicated region body
PF: predicated region fallthrough
CT: control target
= control target key end

     0   :  { %s1055_s0 = inlined_call_operand.vmem [shape: s32[4], index: 0, kind: input, shape index: {}]   ;;  %s1056_s2 = inlined_call_operand.hbm [shape: f32[4,16,128], index: 2, kind: input, shape index: {}, may-alias: {2,3}]   ;;  %s1057_s3 = inlined_call_operand.hbm [shape: f32[4,16,128], index: 3, kind: input, shape index: {}, may-alias: {2,3}]   ;;  %s1058_s4 = inlined_call_operand.hbm [shape: f32[4,16,128], index: 4, kind: output, shape index: {}]   ;;  %s1059_s1 = inlined_call_operand.vmem [shape: f32[4], index: 1, kind: input, shape index: {}]  }
   0x1   :  { %1068 = sst [smem:[#allocation18_spill]] %s1056_s2  ;;  %s9_s17 = sshll.u32 %s1055_s0, 4  ;;  %s10_s17 = int_to_ptr.vmem [resolvable:$true] %s9_s17 }
   0x2   :  { %s13_s20 = sshll.u32 %s1059_s1, 4  ;;  %s509_s21 = scalar_lea.vmem %s10_s17, 16  ;;  %s14_s20 = int_to_ptr.vmem [resolvable:$true] %s13_s20 }
   0x3   :  { %p510_p0 = scmp.ne.s32.totalorder %s10_s17, %s509_s21  ;;  %p514_p1 = scmp.lt.s32.totalorder %s10_s17, %s10_s17 }
   0x4   :  { %p515_p2 = scmp.lt.s32.totalorder %s509_s21, %s509_s21 }
   0x6   :  { %p516_p3 = por %p515_p2, %p514_p1 }
   0x8   :  { %p517_p4 = pnand %p516_p3, %p510_p0 }
   0xa   :  { %520 = shalt.err (!%p517_p4)  }
   0xb   :  { %s707_s22 = smov [#allocation3]   ;;  %s521_s23 = scalar_lea.vmem %s14_s20, 16 }
   0xc   :  { %12 = dma.vmem_to_smem %s10_s17, 16, %s707_s22, [#allocation2] }
   0xd   :  { %p522_p5 = scmp.ne.s32.totalorder %s14_s20, %s521_s23  ;;  %p526_p6 = scmp.lt.s32.totalorder %s14_s20, %s14_s20 }
   0xe   :  { %p527_p7 = scmp.lt.s32.totalorder %s521_s23, %s521_s23 }
  0x10   :  { %p528_p8 = por %p527_p7, %p526_p6 }
  0x12   :  { %p529_p9 = pnand %p528_p8, %p522_p5 }
  0x14   :  { %532 = shalt.err (!%p529_p9)  }
  0x15   :  { %s708_s0 = smov [#allocation4]  }
  0x16   :  { %16 = dma.vmem_to_smem %s14_s20, 16, %s708_s0, [#allocation2] }
  0x17   :  { %657 = dma.done.wait [#allocation2], 32 }
  0x18   :  { %658 = vsyncadd [#allocation2], 4294967264 }
  0x19   :  { %18 = sfence }
  0x1a   :  { %19 = vsyncpa [#allocation6], 0 }
  0x1b   :  { %21 = vsyncpa [#allocation6 + $0x1], 0 }
  0x1c   :  { %22 = vsyncpa [#allocation9], 0 }
  0x1d   :  { %24 = vsyncpa [#allocation9 + $0x1], 0 }
  0x1e   :  { %25 = vsyncpa [#allocation7], 0 }
  0x1f   :  { %27 = vsyncpa [#allocation7 + $0x1], 0  ;;  %s747_s1 = smov 0   ;;  %s749_s24 = smov 0  }
  0x20   :  { %s751_s25 = smov 0   ;;  %s753_s26 = smov 0  }
  0x21   :  { %s755_s27 = smov 0   ;;  %s757_s28 = smov 0  }
  0x22   :  { %s759_s29 = smov 0   ;;  %s761_s30 = smov 0  }
  0x23   :  { %s763_s5 = smov 0  }
  0x24 LB: > { %s386_s6 = sadd.s32 4294967295, %s705_s5   ;;  %s387_s7 = sadd.s32 4294967294, %s705_s5   ;;  %s705_s5 = sphi %s763_s5, %s33_s5   ;;  %s701_s30 = sphi %s761_s30, %s1099_s30   ;;  %s697_s29 = sphi %s759_s29, %s1098_s29   ;;  %s693_s28 = sphi %s757_s28, %s1097_s28   ;;  %s689_s27 = sphi %s755_s27, %s1096_s27   ;;  %s685_s26 = sphi %s753_s26, %s1095_s26   ;;  %s681_s25 = sphi %s751_s25, %s1094_s25   ;;  %s677_s24 = sphi %s749_s24, %s1093_s24   ;;  %s673_s1 = sphi %s747_s1, %s1092_s1  }
  0x25   : > { %s45_s8 = sadd.s32 1, %s701_s30  ;;  %s54_s9 = sadd.s32 1, %s693_s28 }
  0x26   : > { %p47_p10 = scmp.ge.s32.totalorder %s45_s8, 4  ;;  %p61_p11 = scmp.ne.s32.totalorder %s693_s28, %s689_s27 }
  0x27   : > { %p1061_p12 = scmp.eq.s32.totalorder %s705_s5, 0  ;;  %p67_p13 = scmp.ne.s32.totalorder %s689_s27, %s685_s26 }
  0x28   : > { %s1101_s8 = smov (%p47_p10, %s45_s8), 0  ;;  %p812_p1 = scmp.eq.s32.totalorder %s386_s6, 0 }
  0x29   : > { %1069 = sst [smem:[#allocation17_spill]] %s1101_s8  ;;  %p808_p0 = por %p1061_p12, %p61_p11 }
  0x2a   : > { %s49_s12 = ssub.s32 %s701_s30, %s1101_s8  ;;  %s819_s13 = sld [smem:[#allocation3 + %s701_s30]] }
  0x2b   : > { %p52_p2 = scmp.eq.s32.totalorder %s49_s12, 0  ;;  %p826_p3 = por %p812_p1, %p67_p13 }
  0x2c   : > { %s831_s15 = sld [smem:[#allocation3 + %s1101_s8]]  ;;  %p123_p4 = scmp.eq.s32.totalorder %s386_s6, 3 }
  0x2d   : > { %s1072_s14 = scalar_select %p826_p3, 1, 0 }
  0x2e   : > { %s834_s16 = scalar_select %p52_p2, %s693_s28, %s54_s9  }
  0x2f   : > { %p839_p5 = por %p123_p4, %p61_p11  ;;  %p129_p6 = scmp.eq.s32.totalorder %s387_s7, 3 }
  0x30   : > { %p1060_p7 = scmp.lt.s32.totalorder %s705_s5, 4  ;;  %s149_s19 = sand.u32 1, %s693_s28  }
  0x31   : > { %s1073_s17 = scalar_select %p839_p5, 1, 0 }
  0x32   : > { %p847_p8 = por %p129_p6, %p67_p13  ;;  %s390_s20 = sshll.u32 %s149_s19, 4 }
  0x33   : > { %s405_s21 = sshll.u32 %s701_s30, 8  ;;  %s1075_s2 = sld [smem:[#allocation18_spill]] }
  0x34   : > { %s1074_s18 = scalar_select %p847_p8, 1, 0 }
  0x35   : > { %s153_s6 = scalar_lea.vmem [#allocation5], %s390_s20  ;;  %p864_p9 = pnand %p1060_p7, %p808_p0 }
  0x36   : > { %s162_s7 = sshll.u32 %s153_s6, 4  ;;  %s869_s12 = scalar_lea.sflag [#allocation6], %s149_s19  ;;  %s858_s7 = int_to_ptr.vmem [resolvable:$true] %s162_s7 }
  0x37   : > { %p535_p13 = pneg %p864_p9 }
  0x39   : > { %s856_s0 = scalar_lea.hbm %s1075_s2, %s405_s21  ;;  %s538_s22 = scalar_lea.hbm %s1075_s2, 1024 }
  0x3a   : > { %s533_s21 = scalar_lea.hbm %s856_s0, 256  ;;  %p539_p0 = scmp.lt.u32.totalorder %s856_s0, %s1075_s2 }
  0x3b   : > { %p534_p11 = scmp.ne.s32.totalorder %s856_s0, %s533_s21  ;;  %p540_p6 = scmp.lt.u32.totalorder %s538_s22, %s533_s21 }
  0x3c   : > { %p542_p12 = scmp.lt.u32.totalorder %s533_s21, %s856_s0 }
  0x3d   : > { %p536_p2 = pnand %p535_p13, %p534_p11  ;;  %p541_p7 = por %p540_p6, %p539_p0 }
  0x3f   : > { %p537_p4 = pneg %p536_p2  ;;  %p543_p10 = por %p542_p12, %p541_p7 }
  0x41   : > { %p544_p8 = pnand %p543_p10, %p537_p4 }
  0x43   : > { %547 = shalt.err (!%p544_p8)
}
  0x44   : > { %s548_s19 = scalar_lea.vmem %s858_s7, 256  ;;  %s709_s20 = smov [#allocation5]  }
  0x45   : > { %p549_p11 = scmp.ne.s32.totalorder %s858_s7, %s548_s19  ;;  %s553_s10 = sshll.u32 %s709_s20, 4  ;;  %s554_s10 = int_to_ptr.vmem [resolvable:$false] %s553_s10 }
  0x46   : > { %s555_s23 = scalar_lea.vmem %s554_s10, 512  ;;  %p556_p3 = scmp.lt.s32.totalorder %s858_s7, %s554_s10 }
  0x47   : > { %p551_p2 = pnand %p549_p11, %p535_p13  ;;  %p557_p0 = scmp.lt.s32.totalorder %s555_s23, %s548_s19 }
  0x49   : > { %p552_p5 = pneg %p551_p2  ;;  %p558_p6 = por %p557_p0, %p556_p3 }
  0x4b   : > { %p559_p12 = pnand %p558_p6, %p552_p5 }
  0x4d   : > { %562 = shalt.err (!%p559_p12)
}
  0x4e   : > { %s1064_s21 = smov 128   ;;  %s1065_s22 = smov 8  }
  0x4f   : > { %419 = dma.hbm_to_vmem [thread:$0]  (!%p864_p9), %s856_s0, 256, %s858_s7, %s869_s12, %s1064_s21, %s1064_s21, %s1065_s22  }
  0x50   : > { %p194_p3 = scmp.lt.s32.totalorder %s705_s5, 5  ;;  %p1077_p5 = scmp.ge.s32.totalorder %s705_s5, 1 }
  0x51   : > { %s79_s19 = ssub.s32 %s819_s13, %s831_s15  ;;  %s84_s20 = sadd.s32 1, %s681_s25 }
  0x52   : > { %p903_p7 = pnand %p1077_p5, %p194_p3  ;;  %p82_p8 = scmp.eq.s32.totalorder %s79_s19, 0 }
  0x53   : > { %p91_p10 = scmp.ne.s32.totalorder %s681_s25, %s677_s24  ;;  %p97_p13 = scmp.ne.s32.totalorder %s677_s24, %s673_s1 }
  0x54   : > { %s172_s10 = sand.u32 1, %s681_s25   ;;  %p1079_p4 = scmp.eq.s32.totalorder %s705_s5, 0 }
  0x55   : > { %s916_s9 = scalar_select %p82_p8, %s681_s25, %s84_s20  }
  0x56   : > { %p93_p11 = por %p91_p10, %p1079_p4  ;;  %p922_p9 = por %p97_p13, %p812_p1 }
  0x57   : > { %s393_s7 = sshll.u32 %s172_s10, 4  ;;  %p1081_p2 = scmp.lt.s32.totalorder %s705_s5, 4 }
  0x58   : > { %s1080_s0 = scalar_select %p922_p9, 1, 0 }
  0x59   : > { %p928_p0 = pnand %p1081_p2, %p93_p11  ;;  %p1083_p6 = pmov %p1081_p2 }
  0x5a   : > { %s409_s13 = scalar_select %p93_p11, [#allocation3], [#allocation11] }
  0x5b   : > { %s410_s1 = scalar_select %p93_p11, %s701_s30, 0 }
  0x5c   : > { %s1103_s13 = smov (!%p1083_p6, %s409_s13), [#allocation12]  ;;  %p1084_p12 = pmov %p1081_p2 }
  0x5d   : > { %s176_s11 = scalar_lea.vmem [#allocation8], %s393_s7  ;;  %s944_s2 = scalar_lea.sflag [#allocation9], %s172_s10 }
  0x5e   : > { %s1105_s1 = smov (!%p1084_p12, %s410_s1), 0  ;;  %s186_s23 = sshll.u32 %s176_s11, 4  ;;  %s937_s23 = int_to_ptr.vmem [resolvable:$true] %s186_s23 }
  0x5f   : > { %s177_s15 = sld [smem:[%s1103_s13 + %s1105_s1]]  ;;  %p565_p3 = pneg %p928_p0 }
  0x60   : > { %s568_s21 = scalar_lea.hbm %s1057_s3, 1024 }
  0x65   : > { %s406_s19 = sshll.u32 %s177_s15, 8 }
  0x66   : > { %s942_s22 = scalar_lea.hbm %s1057_s3, %s406_s19 }
  0x67   : > { %s563_s8 = scalar_lea.hbm %s942_s22, 256  ;;  %p569_p10 = scmp.lt.u32.totalorder %s942_s22, %s1057_s3 }
  0x68   : > { %p564_p1 = scmp.ne.s32.totalorder %s942_s22, %s563_s8  ;;  %p570_p13 = scmp.lt.u32.totalorder %s568_s21, %s563_s8 }
  0x69   : > { %p572_p11 = scmp.lt.u32.totalorder %s563_s8, %s942_s22 }
  0x6a   : > { %p566_p5 = pnand %p565_p3, %p564_p1  ;;  %p571_p4 = por %p570_p13, %p569_p10 }
  0x6c   : > { %p567_p8 = pneg %p566_p5  ;;  %p573_p2 = por %p572_p11, %p571_p4 }
  0x6e   : > { %p574_p6 = pnand %p573_p2, %p567_p8 }
  0x70   : > { %577 = shalt.err (!%p574_p6)
}
  0x71   : > { %s578_s10 = scalar_lea.vmem %s937_s23, 256  ;;  %s712_s11 = smov [#allocation8]  }
  0x72   : > { %p579_p12 = scmp.ne.s32.totalorder %s937_s23, %s578_s10  ;;  %s583_s19 = sshll.u32 %s712_s11, 4  ;;  %s584_s19 = int_to_ptr.vmem [resolvable:$false] %s583_s19 }
  0x73   : > { %s585_s20 = scalar_lea.vmem %s584_s19, 512  ;;  %p586_p9 = scmp.lt.s32.totalorder %s937_s23, %s584_s19 }
  0x74   : > { %p581_p1 = pnand %p579_p12, %p565_p3  ;;  %p587_p10 = scmp.lt.s32.totalorder %s585_s20, %s578_s10 }
  0x76   : > { %p582_p5 = pneg %p581_p1  ;;  %p588_p13 = por %p587_p10, %p586_p9 }
  0x78   : > { %p589_p4 = pnand %p588_p13, %p582_p5 }
  0x7a   : > { %592 = shalt.err (!%p589_p4)
}
  0x7b   : > { %s1085_s8 = smov 8   ;;  %s1086_s7 = smov 128  }
  0x7c   : > { %424 = dma.hbm_to_vmem [thread:$0]  (!%p928_p0), %s942_s22, 256, %s937_s23, %s944_s2, %s1086_s7, %s1086_s7, %s1085_s8  }
  0x7d   : > { %198 = sbr.rel (%p903_p7) target bundleno = 164 (0xa4), region = 28  ;;  %s978_s13 = sand.u32 (!%p903_p7), 1, %s689_s27  }
  0x7e   : > { %s397_s21 = sshll.u32 (!%p903_p7), %s978_s13, 4  ;;  %s201_s1 = scalar_lea.sflag (!%p903_p7), [#allocation6], %s978_s13 }
  0x7f   : > { %s204_s15 = scalar_lea.vmem (!%p903_p7), [#allocation5], %s397_s21  ;;  %p1087_p9 = scmp.ne.s32.totalorder (!%p903_p7), %s1072_s14, 0 }
  0x84   : > { %660 = dma.done.wait (%p1087_p9), %s201_s1, 256  }
  0x85   : > { %662 = vsyncadd (%p1087_p9), %s201_s1, 4294967040  ;;  %s209_s2 = sand.u32 1, %s677_s24   ;;  %p1088_p7 = scmp.ne.s32.totalorder %s1080_s0, 0 }
  0x86   : > { %s398_s22 = sshll.u32 %s209_s2, 4  ;;  %s210_s6 = scalar_lea.sflag [#allocation9], %s209_s2 }
  0x87   : > { %s213_s12 = scalar_lea.vmem [#allocation8], %s398_s22 }
  0x88   : > { %664 = dma.done.wait (%p1088_p7), %s210_s6, 256  }
  0x89   : > { %666 = vsyncadd (%p1088_p7), %s210_s6, 4294967040  ;;  %s243_s23 = sld [smem:[#allocation4 + %s697_s29]]  ;;  %v244_v0 = vld [vmem:[%s204_s15] sm:$0xff]  ;;  %v245_v3 = vld [vmem:[%s204_s15 + $0x8] sm:$0xff]  ;;  %s238_s14 = scalar_lea.vmem [#allocation10], %s397_s21 }
  0x8a   : > { %v246_v1 = vld [vmem:[%s213_s12] sm:$0xff]  ;;  %v247_v5 = vld [vmem:[%s213_s12 + $0x8] sm:$0xff]  ;;  %s273_s10 = sshll.u32 %s238_s14, 4  ;;  %s407_s11 = sshll.u32 %s697_s29, 8  ;;  %s993_s10 = int_to_ptr.vmem [resolvable:$true] %s273_s10 }
  0x8b   : > { %v248_v4 = vsub.f32 %v244_v0, %v246_v1  ;;  %v249_v6 = vsub.f32 %v245_v3, %v247_v5  ;;  %s998_s20 = scalar_lea.hbm %s1058_s4, %s407_s11  ;;  %s258_s8 = scalar_lea.sflag [#allocation7], %s978_s13 }
  0x8c   : > { %s593_s7 = scalar_lea.vmem %s993_s10, 256  ;;  %p1089_p3 = scmp.ne.s32.totalorder %s1073_s17, 0 }
  0x8d   : > { %p594_p0 = scmp.ne.s32.totalorder %s993_s10, %s593_s7  ;;  %s713_s29 = smov [#allocation10]  }
  0x8e   : > { %s597_s21 = sshll.u32 %s713_s29, 4  ;;  %s598_s21 = int_to_ptr.vmem [resolvable:$false] %s597_s21 }
  0x8f   : > { %v250_v2 = vstv %s243_s23  ;;  %p595_p8 = pnand %p594_p0, %p1089_p3  ;;  %s599_s1 = scalar_lea.vmem %s598_s21, 512 }
  0x90   : > { %v251_v7 = vmul.f32 %v250_v2, %v248_v4  ;;  %v252_v8 = vmul.f32 %v250_v2, %v249_v6  ;;  %p600_p2 = scmp.lt.s32.totalorder %s993_s10, %s598_s21  ;;  %p601_p6 = scmp.lt.s32.totalorder %s599_s1, %s593_s7 }
  0x91   : > { %p596_p11 = pneg %p595_p8 }
  0x92   : > { %v253_v9 = vadd.f32 %v251_v7, %v246_v1  ;;  %v254_v10 = vadd.f32 %v252_v8, %v247_v5  ;;  %p602_p12 = por %p601_p6, %p600_p2 }
  0x94   : > { %255 = vst [vmem:[%s238_s14] sm:$0xff] %v253_v9  ;;  %256 = vst [vmem:[%s238_s14 + $0x8] sm:$0xff] %v254_v10  ;;  %p603_p1 = pnand %p602_p12, %p596_p11 }
  0x96   : > { %606 = shalt.err (!%p603_p1)
}
  0x97   : > { %s607_s15 = scalar_lea.hbm %s998_s20, 256  ;;  %s611_s6 = scalar_lea.hbm %s1058_s4, 1024 }
  0x98   : > { %p608_p5 = scmp.ne.s32.totalorder %s998_s20, %s607_s15  ;;  %p612_p4 = scmp.lt.u32.totalorder %s998_s20, %s1058_s4 }
  0x99   : > { %p613_p9 = scmp.lt.u32.totalorder %s611_s6, %s607_s15  ;;  %p615_p0 = scmp.lt.u32.totalorder %s607_s15, %s998_s20 }
  0x9a   : > { %p609_p10 = pnand %p608_p5, %p1089_p3 }
  0x9b   : > { %p614_p7 = por %p613_p9, %p612_p4 }
  0x9c   : > { %p610_p13 = pneg %p609_p10 }
  0x9d   : > { %p616_p8 = por %p615_p0, %p614_p7 }
  0x9f   : > { %p617_p11 = pnand %p616_p8, %p610_p13 }
  0xa1   : > { %620 = shalt.err (!%p617_p11)
}
  0xa2   : > { %s714_s14 = smov 128   ;;  %s715_s11 = smov 8  }
  0xa3   : > { %414 = dma.vmem_to_hbm [thread:$0]  (%p1089_p3), %s993_s10, 256, %s998_s20, %s258_s8, %s714_s14, %s714_s14, %s715_s11  }
  0xa4 PF: > { %p430_p2 = scmp.ge.s32.totalorder %s705_s5, 2  ;;  %s288_s0 = sand.u32 1, %s685_s26  }
  0xa5   : > { %p1090_p6 = scmp.ne.s32.totalorder %s1074_s18, 0  ;;  %s289_s19 = scalar_lea.sflag [#allocation7], %s288_s0 }
  0xa7   : > { %p426_p12 = pnand %p430_p2, %p1090_p6 }
  0xa9   : > { %668 = dma.done.wait (!%p426_p12), %s289_s19, 256  }
  0xaa   : > { %670 = vsyncadd (!%p426_p12), %s289_s19, 4294967040  ;;  %s33_s5 = sadd.s32 1, %s705_s5   ;;  %s1091_s17 = sld [smem:[#allocation17_spill]] }
  0xab   : > { %p30_p1 = scmp.ge.s32.totalorder %s33_s5, 6   ;;  %s1092_s1 = smov %s677_s24 }
  0xac   : > { %s1093_s24 = smov %s681_s25  ;;  %s1094_s25 = smov %s916_s9 }
  0xad   : > { %s1095_s26 = smov %s689_s27  ;;  %s1096_s27 = smov %s693_s28 }
  0xae   : > { %s1097_s28 = smov %s834_s16  ;;  %s1098_s29 = smov %s701_s30 }
  0xaf   :  { %32 = sbr.rel (!%p30_p1) target bundleno = 36 (0x24), region = 86 }
  0xb0   : > { %s1099_s30 = smov %s1091_s17 }
  0xb6   :  { %294 = vsyncpa [#allocation6], 1 }
  0xb7   :  { %296 = vsyncpa [#allocation6 + $0x1], 1 }
  0xb8   :  { %297 = vsyncpa [#allocation9], 1 }
  0xb9   :  { %299 = vsyncpa [#allocation9 + $0x1], 1 }
  0xba   :  { %300 = vsyncpa [#allocation7], 1 }
  0xbb   :  { %302 = vsyncpa [#allocation7 + $0x1], 1 }

</bundles_post_ra>
